<compile_context>
chip_gen: v7x
topology: tpu7x:2x2x1
jax: 0.10.0
libtpu: 0.0.40
codegen_flags: <defaults>
</compile_context>

<pallas_src>
import math
from functools import partial

import jax
import jax.numpy as jnp
from jax.experimental import pallas as pl
from jax.experimental.pallas import tpu as pltpu


# --------------------------- generation-aware sizing ---------------------------

def _hw_config():
    """VMEM limit + matmul tile targets per TPU generation."""
    vmem_phys = None
    try:
        info = pltpu.get_tpu_info()
        vmem_phys = getattr(info, "vmem_capacity_bytes", None)
    except Exception:
        vmem_phys = None
    if vmem_phys is None:
        vmem_phys = 64 * 1024 * 1024  # conservative default (v7x-sized)
    if vmem_phys >= 100 * 1024 * 1024:
        # v5e / v6e: 128 MiB physical VMEM -> big tiles, deep K reduction
        return {"vmem_limit": 100 * 1024 * 1024, "tm": 512, "tn": 512, "tk": 1024}
    # v7x: 64 MiB physical VMEM -> leave headroom
    return {"vmem_limit": 48 * 1024 * 1024, "tm": 256, "tn": 256, "tk": 512}


def _round_up(x, m):
    return ((x + m - 1) // m) * m


def _choose_tile(dim, target, align):
    """Aligned tile <= target (dim is later zero-padded to a multiple of the tile)."""
    if dim <= target:
        return _round_up(dim, align)
    return max(align, (target // align) * align)


def _pad2d(a, rows, cols):
    r, c = a.shape
    if r == rows and c == cols:
        return a
    return jnp.pad(a, ((0, rows - r), (0, cols - c)))


# ------------------ tiled linear (+ fused bias / GELU / PostNorm tail) ------------------

def _linear_kernel(*refs, act, has_bias, pn):
    idx = 0
    x_ref = refs[idx]; idx += 1
    w_ref = refs[idx]; idx += 1
    b_ref = None
    if has_bias:
        b_ref = refs[idx]; idx += 1
    res_ref = nw_ref = None
    if pn is not None:
        res_ref = refs[idx]; idx += 1
        nw_ref = refs[idx]; idx += 1
    o_ref = refs[idx]; idx += 1
    acc_ref = refs[idx]

    k = pl.program_id(2)

    @pl.when(k == 0)
    def _():
        acc_ref[...] = jnp.zeros_like(acc_ref)

    acc_ref[...] += jnp.dot(x_ref[...], w_ref[...], preferred_element_type=jnp.float32)

    @pl.when(k == pl.num_programs(2) - 1)
    def _():
        y = acc_ref[...]
        if has_bias:
            y = y + b_ref[...].astype(jnp.float32)
        if act == "gelu":
            # exact erf-based GELU (torch.nn.GELU default)
            y = 0.5 * y * (1.0 + jax.lax.erf(y * (1.0 / math.sqrt(2.0))))
        if pn is not None:
            scale_residual, rms_scale, eps = pn
            s = y + scale_residual * res_ref[...].astype(jnp.float32)
            # RMSNorm with eps-clamped L2 norm: 1/max(||s||*d^-.5, eps) == rsqrt(max(ms, eps^2))
            ms = jnp.sum(s * s, axis=-1, keepdims=True) * (rms_scale * rms_scale)
            inv = jax.lax.rsqrt(jnp.maximum(ms, eps * eps))
            y = s * inv * nw_ref[...].astype(jnp.float32)
        o_ref[...] = y.astype(o_ref.dtype)


def pallas_linear(x2d, w, b=None, act=None, *, postnorm=None, compute_dtype=None, hw=None):
    """y = act(x2d @ w + b); if `postnorm` is given, additionally applies
    RMSNorm(y + scale_residual * residual) fused into the K-reduction finalize."""
    hw = hw or _hw_config()
    M, K = x2d.shape
    Kw, N = w.shape
    assert K == Kw
    out_dtype = x2d.dtype

    if compute_dtype is not None:
        # HBM-side cast: halves bytes moved for x/w and halves double-buffer VMEM.
        # Slightly diverges from an f32 torch matmul for large K (flag-gated, off by default).
        x2d = x2d.astype(compute_dtype)
        w = w.astype(compute_dtype)
    itemsize = jnp.dtype(x2d.dtype).itemsize

    tm = _choose_tile(M, hw["tm"], 8 if itemsize >= 4 else 16)
    tk = _choose_tile(K, hw["tk"], 128)
    if postnorm is None:
        tn = _choose_tile(N, hw["tn"], 128)
    else:
        # finalize must hold complete rows for the fused RMSNorm -> full (padded) width
        tn = _round_up(N, 128)
        # shrink the row tile so the full-width tiles still fit the VMEM budget
        per_row = (2 * tk * itemsize            # x (double-buffered)
                   + 2 * tn * itemsize          # residual (double-buffered)
                   + 2 * tn * jnp.dtype(out_dtype).itemsize   # output
                   + tn * 4)                    # f32 accumulator
        w_bytes = 2 * tk * tn * itemsize
        avail = int(hw["vmem_limit"] * 0.6) - w_bytes
        if avail > 0:
            tm = min(tm, max(8, (avail // per_row) // 8 * 8))

    Mp, Kp, Np = _round_up(M, tm), _round_up(K, tk), _round_up(N, tn)
    grid = (Mp // tm, Np // tn, Kp // tk)

    in_specs = [pl.BlockSpec((tm, tk), lambda i, j, k: (i, k)),
                pl.BlockSpec((tk, tn), lambda i, j, k: (k, j))]
    args = [_pad2d(x2d, Mp, Kp), _pad2d(w, Kp, Np)]

    has_bias = b is not None
    if has_bias:
        in_specs.append(pl.BlockSpec((1, tn), lambda i, j, k: (0, j)))
        args.append(_pad2d(b.reshape(1, N), 1, Np))

    pn = None
    if postnorm is not None:
        pn = (float(postnorm["scale_residual"]), N ** -0.5, float(postnorm["eps"]))
        in_specs.append(pl.BlockSpec((tm, tn), lambda i, j, k: (i, j)))   # residual x
        args.append(_pad2d(postnorm["residual"], Mp, Np))
        in_specs.append(pl.BlockSpec((1, tn), lambda i, j, k: (0, j)))    # norm weight
        args.append(_pad2d(postnorm["norm_weight"].reshape(1, N), 1, Np))

    out = pl.pallas_call(
        partial(_linear_kernel, act=act, has_bias=has_bias, pn=pn),
        out_shape=jax.ShapeDtypeStruct((Mp, Np), out_dtype),
        grid=grid,
        in_specs=in_specs,
        out_specs=pl.BlockSpec((tm, tn), lambda i, j, k: (i, j)),
        scratch_shapes=[pltpu.VMEM((tm, tn), jnp.float32)],
        compiler_params=pltpu.CompilerParams(
            dimension_semantics=("parallel", "parallel", "arbitrary"),
            vmem_limit_bytes=hw["vmem_limit"]),
    )(*args)
    if Mp != M or Np != N:
        out = out[:M, :N]
    return out


# --------------- standalone fused residual-scale + add + RMSNorm (generic fn) ---------------

def _postnorm_kernel(y_ref, x_ref, w_ref, o_ref, *, scale_residual, rms_scale, eps):
    s = y_ref[...].astype(jnp.float32) + scale_residual * x_ref[...].astype(jnp.float32)
    ms = jnp.sum(s * s, axis=-1, keepdims=True) * (rms_scale * rms_scale)
    inv = jax.lax.rsqrt(jnp.maximum(ms, eps * eps))
    o_ref[...] = (s * inv * w_ref[...].astype(jnp.float32)).astype(o_ref.dtype)


def pallas_postnorm_residual(y2d, x2d, weight, *, scale_residual, eps, hw=None):
    """RMSNorm(y + scale_residual * x) in one mem-bound pass (used when fn is arbitrary)."""
    hw = hw or _hw_config()
    M, D = x2d.shape
    itemsize = jnp.dtype(x2d.dtype).itemsize
    align = 8 if itemsize >= 4 else 16
    Dp = _round_up(D, 128)                     # lane-dense stores

    # Row tile from a VMEM budget: 3 streams x double-buffer x Dp x bytes.
    budget = hw["vmem_limit"] // 2
    tm = max(align, (budget // (3 * 2 * Dp * max(itemsize, 1))) // align * align)
    tm = min(tm, 1024)
    Mp0 = _round_up(M, align)
    if Mp0 >= 2 * align:                       # keep >=2 grid steps (v7x megacore)
        tm = min(tm, max(align, (Mp0 // 2) // align * align))
    tm = min(tm, Mp0)
    Mp = _round_up(M, tm)

    out = pl.pallas_call(
        partial(_postnorm_kernel, scale_residual=float(scale_residual),
                rms_scale=D ** -0.5, eps=float(eps)),
        out_shape=jax.ShapeDtypeStruct((Mp, Dp), x2d.dtype),
        grid=(Mp // tm,),
        in_specs=[pl.BlockSpec((tm, Dp), lambda i: (i, 0)),
                  pl.BlockSpec((tm, Dp), lambda i: (i, 0)),
                  pl.BlockSpec((1, Dp), lambda i: (0, 0))],
        out_specs=pl.BlockSpec((tm, Dp), lambda i: (i, 0)),
        compiler_params=pltpu.CompilerParams(
            dimension_semantics=("parallel",),
            vmem_limit_bytes=hw["vmem_limit"]),
    )(_pad2d(y2d, Mp, Dp), _pad2d(x2d, Mp, Dp), _pad2d(weight.reshape(1, D), 1, Dp))
    if Mp != M or Dp != D:
        out = out[:M, :D]
    return out


# --------------------------- PostNorm module-level wrappers ---------------------------

def post_norm(x, fn, norm_weight, *args, scale_residual=1.0, eps=1e-8, **kwargs):
    """Generic PostNorm.forward for an arbitrary wrapped sub-module `fn`."""
    y = fn(x, *args, **kwargs)
    D = x.shape[-1]
    out2d = pallas_postnorm_residual(y.reshape(-1, D), x.reshape(-1, D), norm_weight,
                                     scale_residual=scale_residual, eps=eps)
    return out2d.reshape(x.shape)


def feed_forward(x, params, hw=None):
    """Demo fn: RETRO-style FeedForward (linear -> GELU -> linear)."""
    B, T, D = x.shape
    h = pallas_linear(x.reshape(B * T, D), params["w1"], params["b1"], act="gelu", hw=hw)
    o = pallas_linear(h, params["w2"], params["b2"], hw=hw)
    return o.reshape(B, T, D)


def post_norm_feedforward(x, params, norm_weight, *, scale_residual=1.0, eps=1e-8,
                          compute_dtype=None):
    """PostNorm(FeedForward) with the residual+RMSNorm tail fused into the w2 matmul's
    finalize step (saves a full HBM round-trip of fn(x))."""
    B, T, D = x.shape
    x2d = x.reshape(B * T, D)
    hw = _hw_config()
    h = pallas_linear(x2d, params["w1"], params["b1"], act="gelu",
                      compute_dtype=compute_dtype, hw=hw)
    out2d = pallas_linear(
        h, params["w2"], params["b2"],
        postnorm={"residual": x2d, "norm_weight": norm_weight,
                  "scale_residual": scale_residual, "eps": eps},
        compute_dtype=compute_dtype, hw=hw)
    return out2d.reshape(B, T, D)


# ------------------------------------- main -------------------------------------

if __name__ == "__main__":
    B, T, D, FF_INNER = 2, 8, 128, 256      # D multiple of 128 -> lane-dense output slabs
    SCALE_RESIDUAL = 1.0
    EPS = 1e-8

    key = jax.random.PRNGKey(0)
    kx, k1, k2 = jax.random.split(key, 3)
    x = jax.random.normal(kx, (B, T, D), jnp.float32)
    ff_params = dict(
        w1=jax.random.normal(k1, (D, FF_INNER), jnp.float32) * 0.02,
        b1=jnp.zeros((FF_INNER,), jnp.float32),
        w2=jax.random.normal(k2, (FF_INNER, D), jnp.float32) * 0.02,
        b2=jnp.zeros((D,), jnp.float32),
    )
    norm_weight = jnp.ones((D,), jnp.float32)   # matches nn.Parameter(torch.ones(dim)) init

    # Fused path (tail folded into the w2 matmul finalize).
    out_fused = post_norm_feedforward(x, ff_params, norm_weight,
                                      scale_residual=SCALE_RESIDUAL, eps=EPS)
    out_fused = jax.block_until_ready(out_fused)

    # Generic PostNorm path (arbitrary fn -> standalone fused residual+RMSNorm kernel).
    out_generic = post_norm(x, partial(feed_forward, params=ff_params), norm_weight,
                            scale_residual=SCALE_RESIDUAL, eps=EPS)
    out_generic = jax.block_until_ready(out_generic)

    # Plain-JAX reference for PostNorm(FeedForward)
    def _gelu(t):
        return 0.5 * t * (1.0 + jax.lax.erf(t * (1.0 / math.sqrt(2.0))))

    h_ref = _gelu(x @ ff_params["w1"] + ff_params["b1"])
    y_ref = h_ref @ ff_params["w2"] + ff_params["b2"]
    s_ref = y_ref + SCALE_RESIDUAL * x
    norm_ref = jnp.sqrt(jnp.sum(s_ref * s_ref, axis=-1, keepdims=True)) * (D ** -0.5)
    ref = s_ref / jnp.maximum(norm_ref, EPS) * norm_weight

    assert out_fused.shape == (B, T, D) and out_fused.dtype == jnp.float32
    err_fused = float(jnp.max(jnp.abs(out_fused - ref)))
    err_generic = float(jnp.max(jnp.abs(out_generic - ref)))
    assert err_fused < 1e-2 and err_generic < 1e-2, (err_fused, err_generic)

    print("KERNEL_OK")
</pallas_src>

<mosaic_0001>
module attributes {stable_mosaic.version = 11 : i64} {
  func.func @_linear_kernel(%arg0: i32, %arg1: i32, %arg2: i32, %arg3: memref<16x128xf32, #tpu.memory_space<vmem>>, %arg4: memref<128x256xf32, #tpu.memory_space<vmem>>, %arg5: memref<1x256xf32, #tpu.memory_space<vmem>>, %arg6: memref<16x256xf32, #tpu.memory_space<vmem>>, %arg7: memref<16x256xf32, #tpu.memory_space<vmem>>) attributes {dimension_semantics = [#tpu.dimension_semantics<parallel>, #tpu.dimension_semantics<parallel>, #tpu.dimension_semantics<arbitrary>], iteration_bounds = array<i64: 1, 1, 1>, scalar_prefetch = 0 : i64, scratch_operands = 1 : i64, tpu.core_type = #tpu.core_type<tc>, window_params = [{transform_indices = @transform_0, window_bounds = array<i64: 16, 128>}, {transform_indices = @transform_1, window_bounds = array<i64: 128, 256>}, {transform_indices = @transform_2, window_bounds = array<i64: 1, 256>}, {transform_indices = @transform_3, window_bounds = array<i64: 16, 256>}]} {
    %c0_i32 = arith.constant 0 : i32
    %0 = arith.cmpi eq, %arg2, %c0_i32 : i32
    %1 = arith.extui %0 : i1 to i32
    %c0_i32_0 = arith.constant 0 : i32
    %2 = arith.cmpi ne, %1, %c0_i32_0 : i32
    scf.if %2 {
      %cst_10 = arith.constant 0.000000e+00 : f32
      %12 = vector.broadcast %cst_10 : f32 to vector<16x256xf32>
      %c0_11 = arith.constant 0 : index
      %c0_12 = arith.constant 0 : index
      %13 = vector.load %arg7[%c0_11, %c0_12] : memref<16x256xf32, #tpu.memory_space<vmem>>, vector<16x256xf32>
      tpu.vector_store %arg7[%c0_11, %c0_12], %12 {strides = array<i32>} : memref<16x256xf32, #tpu.memory_space<vmem>>, vector<16x256xf32>,
    } else {
    }
    %c0 = arith.constant 0 : index
    %c0_1 = arith.constant 0 : index
    %3 = vector.load %arg7[%c0, %c0_1] : memref<16x256xf32, #tpu.memory_space<vmem>>, vector<16x256xf32>
    %c0_2 = arith.constant 0 : index
    %c0_3 = arith.constant 0 : index
    %4 = vector.load %arg3[%c0_2, %c0_3] : memref<16x128xf32, #tpu.memory_space<vmem>>, vector<16x128xf32>
    %c0_4 = arith.constant 0 : index
    %c0_5 = arith.constant 0 : index
    %5 = vector.load %arg4[%c0_4, %c0_5] : memref<128x256xf32, #tpu.memory_space<vmem>>, vector<128x256xf32>
    %cst = arith.constant dense<0.000000e+00> : vector<16x256xf32>
    %6 = tpu.matmul %4, %5, %cst {dimension_numbers = #tpu.dot_dimension_numbers<[1], [0], [0], [1], [0, 0, 1, 1], [], []>} : vector<16x128xf32>, vector<128x256xf32>, vector<16x256xf32> -> vector<16x256xf32>
    %7 = arith.addf %3, %6 : vector<16x256xf32>
    %c0_6 = arith.constant 0 : index
    %c0_7 = arith.constant 0 : index
    %8 = vector.load %arg7[%c0_6, %c0_7] : memref<16x256xf32, #tpu.memory_space<vmem>>, vector<16x256xf32>
    tpu.vector_store %arg7[%c0_6, %c0_7], %7 {strides = array<i32>} : memref<16x256xf32, #tpu.memory_space<vmem>>, vector<16x256xf32>,
    %c0_i32_8 = arith.constant 0 : i32
    %9 = arith.cmpi eq, %arg2, %c0_i32_8 : i32
    %10 = arith.extui %9 : i1 to i32
    %c0_i32_9 = arith.constant 0 : i32
    %11 = arith.cmpi ne, %10, %c0_i32_9 : i32
    scf.if %11 {
      %c0_10 = arith.constant 0 : index
      %c0_11 = arith.constant 0 : index
      %12 = vector.load %arg7[%c0_10, %c0_11] : memref<16x256xf32, #tpu.memory_space<vmem>>, vector<16x256xf32>
      %c0_12 = arith.constant 0 : index
      %c0_13 = arith.constant 0 : index
      %13 = vector.load %arg5[%c0_12, %c0_13] : memref<1x256xf32, #tpu.memory_space<vmem>>, vector<1x256xf32>
      %14 = vector.broadcast %13 : vector<1x256xf32> to vector<16x256xf32>
      %15 = arith.addf %12, %14 : vector<16x256xf32>
      %cst_14 = arith.constant 5.000000e-01 : f32
      %16 = vector.broadcast %cst_14 : f32 to vector<16x256xf32>
      %17 = arith.mulf %16, %15 : vector<16x256xf32>
      %cst_15 = arith.constant 0.707106769 : f32
      %18 = vector.broadcast %cst_15 : f32 to vector<16x256xf32>
      %19 = arith.mulf %15, %18 : vector<16x256xf32>
      %20 = math.erf %19 : vector<16x256xf32>
      %cst_16 = arith.constant 1.000000e+00 : f32
      %21 = vector.broadcast %cst_16 : f32 to vector<16x256xf32>
      %22 = arith.addf %21, %20 : vector<16x256xf32>
      %23 = arith.mulf %17, %22 : vector<16x256xf32>
      %c0_17 = arith.constant 0 : index
      %c0_18 = arith.constant 0 : index
      %24 = vector.load %arg6[%c0_17, %c0_18] : memref<16x256xf32, #tpu.memory_space<vmem>>, vector<16x256xf32>
      tpu.vector_store %arg6[%c0_17, %c0_18], %23 {strides = array<i32>} : memref<16x256xf32, #tpu.memory_space<vmem>>, vector<16x256xf32>,
    } else {
    }
    return
  }
  func.func @transform_0(%arg0: i32, %arg1: i32, %arg2: i32) -> (i32, i32) {
    %c0_i32 = arith.constant 0 : i32
    return %arg0, %arg2 : i32, i32
  }
  func.func @transform_1(%arg0: i32, %arg1: i32, %arg2: i32) -> (i32, i32) {
    %c0_i32 = arith.constant 0 : i32
    return %arg2, %arg1 : i32, i32
  }
  func.func @transform_2(%arg0: i32, %arg1: i32, %arg2: i32) -> (i32, i32) {
    %c0_i32 = arith.constant 0 : i32
    %c0_i32_0 = arith.constant 0 : i32
    return %c0_i32, %arg1 : i32, i32
  }
  func.func @transform_3(%arg0: i32, %arg1: i32, %arg2: i32) -> (i32, i32) {
    %c0_i32 = arith.constant 0 : i32
    return %arg0, %arg1 : i32, i32
  }
}

</mosaic_0001>

<bundles_post_ra>
// kernel: tpu_custom_call.1
= control target key start
LH: loop header
LB: loop body
LE: loop exit
PB: predicated region body
PF: predicated region fallthrough
CT: control target
= control target key end

     0   :  { %8 = vsyncpa [#allocation4], 0  ;;  %s448_s0 = inlined_call_operand.hbm [shape: f32[16,128], index: 0, kind: input, shape index: {}]   ;;  %s449_s1 = inlined_call_operand.hbm [shape: f32[128,256], index: 1, kind: input, shape index: {}]   ;;  %s450_s2 = inlined_call_operand.vmem [shape: f32[1,256], index: 2, kind: input, shape index: {}]   ;;  %s451_s3 = inlined_call_operand.hbm [shape: f32[16,256], index: 3, kind: output, shape index: {}]  }
   0x1   :  { %9 = vsyncpa [#allocation7], 0 }
   0x2   :  { %10 = vsyncpa [#allocation5], 0  ;;  %s375_s12 = smov [#allocation3]   ;;  %s303_s16 = scalar_lea.hbm %s448_s0, 256 }
   0x3   :  { %s16_s13 = sshll.u32 %s375_s12, 4  ;;  %p304_p0 = scmp.ne.s32.totalorder %s448_s0, %s303_s16  ;;  %s17_s13 = int_to_ptr.vmem [resolvable:$true] %s16_s13 }
   0x4   :  { %p307_p1 = scmp.lt.u32.totalorder %s303_s16, %s448_s0 }
   0x6   :  { %p309_p2 = pnand %p307_p1, %p304_p0 }
   0x8   :  { %312 = shalt.err (!%p309_p2)
}
   0x9   :  { %s313_s21 = scalar_lea.vmem %s17_s13, 256  ;;  %p318_p4 = scmp.lt.s32.totalorder %s17_s13, %s17_s13 }
   0xa   :  { %p314_p3 = scmp.ne.s32.totalorder %s17_s13, %s313_s21  ;;  %p319_p5 = scmp.lt.s32.totalorder %s313_s21, %s313_s21 }
   0xc   :  { %p320_p6 = por %p319_p5, %p318_p4 }
   0xe   :  { %p321_p7 = pnand %p320_p6, %p314_p3 }
  0x10   :  { %324 = shalt.err (!%p321_p7)
}
  0x11   :  { %s376_s22 = smov 128   ;;  %s377_s23 = smov 8  }
  0x12   :  { %22 = dma.hbm_to_vmem [thread:$0]  %s448_s0, 256, %s17_s13, [#allocation4], %s376_s22, %s376_s22, %s377_s23  }
  0x13   :  { %s378_s26 = smov [#allocation6]   ;;  %s325_s30 = scalar_lea.hbm %s449_s1, 4096 }
  0x14   :  { %s28_s27 = sshll.u32 %s378_s26, 4  ;;  %p326_p8 = scmp.ne.s32.totalorder %s449_s1, %s325_s30  ;;  %s29_s27 = int_to_ptr.vmem [resolvable:$true] %s28_s27 }
  0x15   :  { %p329_p9 = scmp.lt.u32.totalorder %s325_s30, %s449_s1 }
  0x17   :  { %p331_p10 = pnand %p329_p9, %p326_p8 }
  0x19   :  { %334 = shalt.err (!%p331_p10)
}
  0x1a   :  { %s335_s8 = scalar_lea.vmem %s29_s27, 4096  ;;  %p340_p12 = scmp.lt.s32.totalorder %s29_s27, %s29_s27 }
  0x1b   :  { %p336_p11 = scmp.ne.s32.totalorder %s29_s27, %s335_s8  ;;  %p341_p13 = scmp.lt.s32.totalorder %s335_s8, %s335_s8 }
  0x1d   :  { %p342_p0 = por %p341_p13, %p340_p12 }
  0x1f   :  { %p343_p1 = pnand %p342_p0, %p336_p11 }
  0x21   :  { %346 = shalt.err (!%p343_p1)
}
  0x22   :  { %s379_s0 = smov 256   ;;  %s380_s9 = smov 16  }
  0x23   :  { %34 = dma.hbm_to_vmem [thread:$0]  %s449_s1, 4096, %s29_s27, [#allocation7], %s379_s0, %s379_s0, %s380_s9  }
  0x24   :  { %369 = dma.done.wait [#allocation4], 256  }
  0x25   :  { %370 = vsyncadd [#allocation4], 4294967040 }
  0x26   :  { %371 = dma.done.wait [#allocation7], 4096  }
  0x27   :  { %372 = vsyncadd [#allocation7], 4294963200  ;;  %v381_v0 = vmov 0.0   ;;  %v58_v1 = vld [vmem:[#allocation6 + $0x8] sm:$0xff]  ;;  %v60_v2 = vld [vmem:[#allocation6 + $0x18] sm:$0xff]  ;;  %v183_v51 = vlaneseq }
  0x28   :  { %153 = vmatprep.mubr.f32.mxu0 %v381_v0  ;;  %159 = vmatprep.mubr.f32.mxu1 %v381_v0  ;;  %v57_v3 = vld [vmem:[#allocation6] sm:$0xff]  ;;  %v239_v4 = vpack.c.bf16 %v60_v2, %v58_v1  ;;  %v59_v5 = vld [vmem:[#allocation6 + $0x10] sm:$0xff]  ;;  %v62_v6 = vld [vmem:[#allocation6 + $0x28] sm:$0xff] }
  0x29   :  { %v64_v7 = vld [vmem:[#allocation6 + $0x38] sm:$0xff]  ;;  %v241_v8 = vpack.c.bf16 %v59_v5, %v57_v3  ;;  %v61_v10 = vld [vmem:[#allocation6 + $0x20] sm:$0xff]  ;;  %v63_v11 = vld [vmem:[#allocation6 + $0x30] sm:$0xff]  ;;  %v184_v52 = vshrl.u32 %v183_v51, 7 }
  0x2a   :  { %v243_v9 = vpack.c.bf16 %v64_v7, %v62_v6  ;;  %v66_v12 = vld [vmem:[#allocation6 + $0x48] sm:$0xff]  ;;  %240 = vmatprep.subr.bf16.mxu0 %v239_v4  ;;  %271 = vmatprep.subr.bf16.mxu1 %v239_v4  ;;  %v68_v13 = vld [vmem:[#allocation6 + $0x58] sm:$0xff]  ;;  %v245_v14 = vpack.c.bf16 %v63_v11, %v61_v10  ;;  %v65_v16 = vld [vmem:[#allocation6 + $0x40] sm:$0xff] }
  0x2b   :  { %242 = vmatpush1.bf16.msra.mxu0 %v241_v8  ;;  %279 = vmatpush1.bf16.msra.mxu1 %v241_v8  ;;  %v247_v15 = vpack.c.bf16 %v68_v13, %v66_v12  ;;  %v67_v17 = vld [vmem:[#allocation6 + $0x50] sm:$0xff]  ;;  %v70_v18 = vld [vmem:[#allocation6 + $0x68] sm:$0xff]  ;;  %v72_v19 = vld [vmem:[#allocation6 + $0x78] sm:$0xff]  ;;  %v185_v53 = vsub.s32 0, %v184_v52  ;;  %v189_v55 = vsub.s32 1, %v184_v52 }
  0x2c   :  { %244 = vmatprep.subr.bf16.mxu0 %v243_v9  ;;  %272 = vmatprep.subr.bf16.mxu1 %v243_v9  ;;  %v249_v20 = vpack.c.bf16 %v67_v17, %v65_v16  ;;  %v251_v21 = vpack.c.bf16 %v72_v19, %v70_v18  ;;  %v69_v22 = vld [vmem:[#allocation6 + $0x60] sm:$0xff]  ;;  %v71_v23 = vld [vmem:[#allocation6 + $0x70] sm:$0xff]  ;;  %v74_v24 = vld [vmem:[#allocation6 + $0x88] sm:$0xff] }
  0x2d   :  { %v76_v25 = vld [vmem:[#allocation6 + $0x98] sm:$0xff]  ;;  %v253_v26 = vpack.c.bf16 %v71_v23, %v69_v22  ;;  %v73_v28 = vld [vmem:[#allocation6 + $0x80] sm:$0xff]  ;;  %v75_v29 = vld [vmem:[#allocation6 + $0x90] sm:$0xff] }
  0x2e   :  { %v255_v27 = vpack.c.bf16 %v76_v25, %v74_v24  ;;  %v78_v30 = vld [vmem:[#allocation6 + $0xa8] sm:$0xff]  ;;  %v80_v31 = vld [vmem:[#allocation6 + $0xb8] sm:$0xff]  ;;  %v257_v32 = vpack.c.bf16 %v75_v29, %v73_v28  ;;  %v77_v34 = vld [vmem:[#allocation6 + $0xa0] sm:$0xff] }
  0x2f   :  { %246 = vmatpush1.bf16.msra.mxu0 %v245_v14  ;;  %280 = vmatpush1.bf16.msra.mxu1 %v245_v14  ;;  %v259_v33 = vpack.c.bf16 %v80_v31, %v78_v30  ;;  %v79_v35 = vld [vmem:[#allocation6 + $0xb0] sm:$0xff]  ;;  %v82_v36 = vld [vmem:[#allocation6 + $0xc8] sm:$0xff]  ;;  %v84_v37 = vld [vmem:[#allocation6 + $0xd8] sm:$0xff] }
  0x30   :  { %248 = vmatprep.subr.bf16.mxu0 %v247_v15  ;;  %273 = vmatprep.subr.bf16.mxu1 %v247_v15  ;;  %v261_v38 = vpack.c.bf16 %v79_v35, %v77_v34  ;;  %v263_v39 = vpack.c.bf16 %v84_v37, %v82_v36  ;;  %v81_v40 = vld [vmem:[#allocation6 + $0xc0] sm:$0xff]  ;;  %v83_v41 = vld [vmem:[#allocation6 + $0xd0] sm:$0xff]  ;;  %v86_v42 = vld [vmem:[#allocation6 + $0xe8] sm:$0xff] }
  0x31   :  { %v88_v43 = vld [vmem:[#allocation6 + $0xf8] sm:$0xff]  ;;  %v265_v44 = vpack.c.bf16 %v83_v41, %v81_v40  ;;  %v85_v46 = vld [vmem:[#allocation6 + $0xe0] sm:$0xff]  ;;  %v87_v47 = vld [vmem:[#allocation6 + $0xf0] sm:$0xff] }
  0x32   :  { %v267_v45 = vpack.c.bf16 %v88_v43, %v86_v42  ;;  %v269_v48 = vpack.c.bf16 %v87_v47, %v85_v46  ;;  %v55_v49 = vld [vmem:[#allocation3] sm:$0xff]  ;;  %v56_v50 = vld [vmem:[#allocation3 + $0x8] sm:$0xff] }
  0x33   :  { %250 = vmatpush1.bf16.msra.mxu0 %v249_v20  ;;  %281 = vmatpush1.bf16.msra.mxu1 %v249_v20  ;;  %v181_v54 = vld [vmem:[%s450_s2] sm:$0x3]  ;;  %s382_s2 = smov [#allocation8]  }
  0x34   :  { %252 = vmatprep.subr.bf16.mxu0 %v251_v21  ;;  %274 = vmatprep.subr.bf16.mxu1 %v251_v21  ;;  %v186_v56 = vrot.slane %v181_v54, %v185_v53  ;;  %v190_v57 = vrot.slane %v181_v54, %v189_v55  ;;  %s226_s13 = sshll.u32 %s382_s2, 4  ;;  %s227_s13 = int_to_ptr.vmem [resolvable:$true] %s226_s13 }
  0x35   :  { %s347_s14 = scalar_lea.vmem %s227_s13, 512  ;;  %p352_p3 = scmp.lt.s32.totalorder %s227_s13, %s227_s13 }
  0x36   :  { %p348_p2 = scmp.ne.s32.totalorder %s227_s13, %s347_s14  ;;  %p353_p4 = scmp.lt.s32.totalorder %s347_s14, %s347_s14 }
  0x37   :  { %254 = vmatpush1.bf16.msra.mxu0 %v253_v26  ;;  %282 = vmatpush1.bf16.msra.mxu1 %v253_v26 }
  0x38   :  { %256 = vmatprep.subr.bf16.mxu0 %v255_v27  ;;  %275 = vmatprep.subr.bf16.mxu1 %v255_v27  ;;  %p354_p5 = por %p353_p4, %p352_p3 }
  0x3a   :  { %p355_p6 = pnand %p354_p5, %p348_p2 }
  0x3b   :  { %258 = vmatpush1.bf16.msra.mxu0 %v257_v32  ;;  %283 = vmatpush1.bf16.msra.mxu1 %v257_v32 }
  0x3c   :  { %260 = vmatprep.subr.bf16.mxu0 %v259_v33  ;;  %276 = vmatprep.subr.bf16.mxu1 %v259_v33 }
  0x3f   :  { %262 = vmatpush1.bf16.msra.mxu0 %v261_v38  ;;  %284 = vmatpush1.bf16.msra.mxu1 %v261_v38 }
  0x40   :  { %264 = vmatprep.subr.bf16.mxu0 %v263_v39  ;;  %277 = vmatprep.subr.bf16.mxu1 %v263_v39 }
  0x43   :  { %266 = vmatpush1.bf16.msra.mxu0 %v265_v44  ;;  %285 = vmatpush1.bf16.msra.mxu1 %v265_v44 }
  0x44   :  { %268 = vmatprep.subr.bf16.mxu0 %v267_v45  ;;  %278 = vmatprep.subr.bf16.mxu1 %v267_v45 }
  0x47   :  { %270 = vmatpush1.bf16.msra.mxu0 %v269_v48  ;;  %286 = vmatpush1.bf16.msra.mxu1 %v269_v48 }
  0x4a   :  { %154 = vmatmul.mubr.f32.vlgmr.msra.gmra.mrb[0].mxu0 %v55_v49  ;;  %160 = vmatmul.mubr.f32.vlgmr.msra.gmra.mrb[0].mxu1 %v56_v50 }
 0x11d   :  { %v155_v58 = vpop.f32.mrb[0].mxu0  ;;  %v161_v59 = vpop.f32.mrb[0].mxu1 }
 0x11e   :  { %v193_v60 = vadd.f32 %v186_v56, %v155_v58  ;;  %v195_v61 = vadd.f32 %v186_v56, %v161_v59  ;;  %v157_v62 = vpop.f32.mrb[1].mxu0  ;;  %v163_v63 = vpop.f32.mrb[1].mxu1 }
 0x11f   :  { %v194_v0 = vadd.f32 %v190_v57, %v157_v62  ;;  %v196_v1 = vadd.f32 %v190_v57, %v163_v63 }
 0x120   :  { %v201_v2 = vmul.f32 0.70710677, %v193_v60  ;;  %v203_v3 = vmul.f32 0.70710677, %v195_v61  ;;  %v197_v8 = vmul.f32 0.5, %v193_v60  ;;  %v199_v11 = vmul.f32 0.5, %v195_v61 }
 0x121   :  { %v202_v4 = vmul.f32 0.70710677, %v194_v0  ;;  %v204_v5 = vmul.f32 0.70710677, %v196_v1  ;;  %v198_v15 = vmul.f32 0.5, %v194_v0  ;;  %v200_v18 = vmul.f32 0.5, %v196_v1 }
 0x122   :  { %295 = verf.f32 %v201_v2 }
 0x123   :  { %297 = verf.f32 %v203_v3 }
 0x124   :  { %299 = verf.f32 %v202_v4 }
 0x125   :  { %301 = verf.f32 %v204_v5 }
 0x12c   :  { %v296_v6 = vpop.eup %295 }
 0x12d   :  { %v298_v7 = vpop.eup %297  ;;  %v209_v9 = vadd.f32 1.0, %v296_v6 }
 0x12e   :  { %v300_v10 = vpop.eup %299  ;;  %v211_v12 = vadd.f32 1.0, %v298_v7 }
 0x12f   :  { %v302_v13 = vpop.eup %301  ;;  %v213_v14 = vmul.f32 %v209_v9, %v197_v8  ;;  %v210_v16 = vadd.f32 1.0, %v300_v10 }
 0x130   :  { %v215_v17 = vmul.f32 %v211_v12, %v199_v11  ;;  %v212_v19 = vadd.f32 1.0, %v302_v13 }
 0x131   :  { %217 = vst [vmem:[#allocation8] sm:$0xff] %v213_v14  ;;  %v214_v20 = vmul.f32 %v210_v16, %v198_v15 }
 0x132   :  { %219 = vst [vmem:[#allocation8 + $0x10] sm:$0xff] %v215_v17  ;;  %v216_v21 = vmul.f32 %v212_v19, %v200_v18 }
 0x133   :  { %218 = vst [vmem:[#allocation8 + $0x8] sm:$0xff] %v214_v20 }
 0x134   :  { %220 = vst [vmem:[#allocation8 + $0x18] sm:$0xff] %v216_v21 }
 0x135   :  { %358 = shalt.err (!%p355_p6)
}
 0x136   :  { %s359_s17 = scalar_lea.hbm %s451_s3, 512 }
 0x137   :  { %p360_p7 = scmp.ne.s32.totalorder %s451_s3, %s359_s17  ;;  %p363_p8 = scmp.lt.u32.totalorder %s359_s17, %s451_s3 }
 0x139   :  { %p365_p9 = pnand %p363_p8, %p360_p7 }
 0x13b   :  { %368 = shalt.err (!%p365_p9)
}
 0x13c   :  { %232 = dma.vmem_to_hbm [thread:$0]  %s227_s13, 512, %s451_s3, [#allocation5], %s379_s0, %s379_s0, %s380_s9  }
 0x13d   :  { %373 = dma.done.wait [#allocation5], 512  }
 0x13e   :  { %374 = vsyncadd [#allocation5], 4294966784 }
 0x13f   :  { %236 = vsyncpa [#allocation4], 1 }
 0x140   :  { %237 = vsyncpa [#allocation7], 1 }
 0x141   :  { %238 = vsyncpa [#allocation5], 1 }

</bundles_post_ra>
